<compile_context>
chip_gen: v5e
topology: v5e:2x2
jax: 0.10.0
libtpu: 0.0.40
codegen_flags: <defaults>
</compile_context>

<pallas_src>
import functools
import math

import jax
import jax.numpy as jnp
from jax.experimental import pallas as pl
from jax.experimental.pallas import tpu as pltpu

_MIB = 1024 * 1024


def _fused_mha_kernel(scale, num_heads_in_group, head_dim, compute_dtype,
                      x_ref, wq_ref, bq_ref, wk_ref, bk_ref, wv_ref, bv_ref,
                      wo_ref, bo_ref, out_ref, attn_ref):
    """One (batch, head_group) grid step.

    Grouped lane-dense QKV projections, per-head softmax(QK^T)V, and the output
    projection accumulated directly into the resident (S, D) output block.
    """
    G, hd = num_heads_in_group, head_dim
    cdt = compute_dtype

    x = x_ref[...].astype(cdt)                                           # (S, D)

    # Lane-dense grouped projections: one (S, D) @ (D, G*hd) MXU matmul per tensor,
    # f32 accumulation.  The softmax scale is folded into q once (after the bias,
    # matching the reference (x@Wq + bq) / sqrt(hd)).
    q = (jnp.dot(x, wq_ref[...].astype(cdt), preferred_element_type=jnp.float32)
         + bq_ref[...]) * scale                                          # (S, G*hd)
    k = (jnp.dot(x, wk_ref[...].astype(cdt), preferred_element_type=jnp.float32)
         + bk_ref[...])                                                  # (S, G*hd)
    v = (jnp.dot(x, wv_ref[...].astype(cdt), preferred_element_type=jnp.float32)
         + bv_ref[...])                                                  # (S, G*hd)
    wo = wo_ref[...].astype(cdt)                                         # (G*hd, D)

    # Output projection is a reduction over head groups: initialise the resident
    # (S, D) block with the bias exactly once (head-group axis is "arbitrary").
    @pl.when(pl.program_id(1) == 0)
    def _init():
        out_ref[...] = jnp.broadcast_to(bo_ref[...], out_ref.shape)

    acc = jnp.zeros(out_ref.shape, jnp.float32)
    for g in range(G):              # unrolled; per-head work stays in vregs / VMEM
        lo, hi = g * hd, (g + 1) * hd
        # Scores contract the LAST dims of both operands -> no K^T relayout (XLU).
        s = jax.lax.dot_general(q[:, lo:hi].astype(cdt), k[:, lo:hi].astype(cdt),
                                (((1,), (1,)), ((), ())),
                                preferred_element_type=jnp.float32)      # (S, S)
        # Numerically-stable softmax with EXACT normalization (rows sum to 1).
        e = jnp.exp(s - jnp.max(s, axis=-1, keepdims=True))
        p = e / jnp.sum(e, axis=-1, keepdims=True)
        attn_ref[g] = p.astype(attn_ref.dtype)
        ctx = jnp.dot(p.astype(cdt), v[:, lo:hi].astype(cdt),
                      preferred_element_type=jnp.float32)                # (S, hd)
        acc = acc + jnp.dot(ctx.astype(cdt), wo[lo:hi, :],
                            preferred_element_type=jnp.float32)          # (S, D)
    out_ref[...] += acc


def _pick_heads_per_step(num_heads, head_dim):
    """Smallest divisor G of H whose grouped projection width G*hd is MXU / lane
    dense (>= 256).  Falls back to all heads (a single head-group step) for small
    models, which also minimizes grid-step overhead at demo shapes."""
    for g in range(1, num_heads + 1):
        if num_heads % g == 0 and g * head_dim >= 256:
            return g
    return num_heads


def _scoped_vmem_limit_bytes():
    """Generation-aware scoped-VMEM limit: ~100 MiB on 128-MiB parts (v5e/v6e),
    ~36 MiB on 64-MiB v7x, always leaving headroom for compiler scratch."""
    try:
        cap = getattr(pltpu.get_tpu_info(), "vmem_capacity_bytes", 128 * _MIB)
    except Exception:  # pragma: no cover - hardware query unavailable
        cap = 128 * _MIB
    return int(max(16 * _MIB, min(cap - 28 * _MIB, 100 * _MIB)))


def mha_forward(x, params, num_heads, *, heads_per_step=None,
                compute_dtype=jnp.bfloat16, attn_dtype=jnp.float32):
    """x: (B, S, D) float32. Returns (out (B, S, D) f32, attn_weights (B, H, S, S))."""
    B, S, D = x.shape
    H = num_heads
    hd = D // H
    assert hd * H == D, "embed_dim must be divisible by num_heads"

    wq, bq, wk, bk, wv, bv, wo, bo = params

    G = heads_per_step or _pick_heads_per_step(H, hd)
    assert H % G == 0, "heads_per_step must divide num_heads"
    HG = H // G                    # number of head groups (grid axis 1)
    Ghd = G * hd                   # grouped projection width (lane dim)

    # One-time head-group-major re-layout of the (constant) weights so every kernel
    # block has full (sublane, lane) extents -- no in-kernel HBM lane slicing.
    to_w = lambda w: w.reshape(D, HG, Ghd).transpose(1, 0, 2)            # (HG, D, Ghd)
    to_b = lambda b: b.reshape(HG, 1, Ghd)                               # (HG, 1, Ghd)
    wq_g, wk_g, wv_g = map(to_w, (wq, wk, wv))
    bq_g, bk_g, bv_g = map(to_b, (bq, bk, bv))
    wo_g = wo.reshape(HG, Ghd, D)                                        # (HG, Ghd, D)

    scale = 1.0 / math.sqrt(hd)
    vmem_limit = _scoped_vmem_limit_bytes()

    w_spec = pl.BlockSpec((None, D, Ghd), lambda b, hg: (hg, 0, 0))
    b_spec = pl.BlockSpec((None, 1, Ghd), lambda b, hg: (hg, 0, 0))

    kernel = functools.partial(_fused_mha_kernel, scale, G, hd, compute_dtype)

    out, attn = pl.pallas_call(
        kernel,
        out_shape=(
            jax.ShapeDtypeStruct((B, S, D), jnp.float32),
            jax.ShapeDtypeStruct((B, H, S, S), attn_dtype),
        ),
        grid_spec=pltpu.PrefetchScalarGridSpec(
            num_scalar_prefetch=0,
            grid=(B, HG),
            in_specs=[
                pl.BlockSpec((None, S, D), lambda b, hg: (b, 0, 0)),     # x (reused over hg)
                w_spec, b_spec,                                          # wq, bq
                w_spec, b_spec,                                          # wk, bk
                w_spec, b_spec,                                          # wv, bv
                pl.BlockSpec((None, Ghd, D), lambda b, hg: (hg, 0, 0)),  # wo
                pl.BlockSpec((1, D), lambda b, hg: (0, 0)),              # bo
            ],
            out_specs=[
                pl.BlockSpec((None, S, D), lambda b, hg: (b, 0, 0)),        # out (accumulator)
                pl.BlockSpec((None, G, S, S), lambda b, hg: (b, hg, 0, 0)),  # attn
            ],
        ),
        compiler_params=pltpu.CompilerParams(
            dimension_semantics=("parallel", "arbitrary"),
            vmem_limit_bytes=vmem_limit),
    )(x, wq_g, bq_g, wk_g, bk_g, wv_g, bv_g, wo_g, bo)

    return out, attn


def mha_reference(x, params, num_heads):
    """Pure-JAX reference mirroring the PyTorch forward (attention_mask=None)."""
    B, S, D = x.shape
    hd = D // num_heads
    wq, bq, wk, bk, wv, bv, wo, bo = params
    q = (x @ wq + bq).reshape(B, S, num_heads, hd).transpose(0, 2, 1, 3)
    k = (x @ wk + bk).reshape(B, S, num_heads, hd).transpose(0, 2, 1, 3)
    v = (x @ wv + bv).reshape(B, S, num_heads, hd).transpose(0, 2, 1, 3)
    scores = jnp.einsum("bhqd,bhkd->bhqk", q, k) / math.sqrt(hd)
    attn = jax.nn.softmax(scores, axis=-1)
    ctx = jnp.einsum("bhqk,bhkd->bhqd", attn, v)
    ctx = ctx.transpose(0, 2, 1, 3).reshape(B, S, D)
    out = ctx @ wo + bo
    return out, attn


if __name__ == "__main__":
    # config: d_model=32, n_heads=4 -> head_dim=8; batch=2, seq_len=8
    B, S, D, H = 2, 8, 32, 4

    key = jax.random.PRNGKey(0)
    keys = jax.random.split(key, 9)
    x = jax.random.normal(keys[0], (B, S, D), dtype=jnp.float32)

    def linear_params(kw, kb):
        w = jax.random.normal(kw, (D, D), dtype=jnp.float32) * (1.0 / math.sqrt(D))
        b = jax.random.normal(kb, (1, D), dtype=jnp.float32) * 0.01
        return w, b

    wq, bq = linear_params(keys[1], keys[2])
    wk, bk = linear_params(keys[3], keys[4])
    wv, bv = linear_params(keys[5], keys[6])
    wo, bo = linear_params(keys[7], keys[8])
    params = (wq, bq, wk, bk, wv, bv, wo, bo)

    out_want, attn_want = mha_reference(x, params, H)

    # 1) Strict-precision mode (f32 matmul operands): matches the module numerics.
    out32, attn32 = jax.block_until_ready(
        mha_forward(x, params, H, compute_dtype=jnp.float32))
    assert out32.shape == (B, S, D) and attn32.shape == (B, H, S, S)
    # Exact softmax normalization: attention rows sum to 1 (correctness fix).
    assert jnp.allclose(jnp.sum(attn32, axis=-1), 1.0, atol=1e-5)
    assert jnp.allclose(attn32, attn_want, atol=1e-2, rtol=1e-2)
    assert jnp.allclose(out32, out_want, atol=1e-2, rtol=1e-2)

    # 2) Default perf mode (bf16 MXU operands, f32 accumulation): tolerance reflects
    #    bf16 operand rounding only; the softmax normalization is still exact.
    outbf, attnbf = jax.block_until_ready(mha_forward(x, params, H))
    assert outbf.shape == (B, S, D) and attnbf.shape == (B, H, S, S)
    assert jnp.allclose(attnbf, attn_want, atol=5e-2, rtol=5e-2)
    assert jnp.allclose(outbf, out_want, atol=5e-2, rtol=5e-2)

    print("KERNEL_OK")
</pallas_src>

<mosaic_0001>
module attributes {stable_mosaic.version = 11 : i64} {
  func.func @_fused_mha_kernel(%arg0: i32, %arg1: i32, %arg2: memref<1x8x32xf32, #tpu.memory_space<vmem>>, %arg3: memref<1x32x32xf32, #tpu.memory_space<vmem>>, %arg4: memref<1x1x32xf32, #tpu.memory_space<vmem>>, %arg5: memref<1x32x32xf32, #tpu.memory_space<vmem>>, %arg6: memref<1x1x32xf32, #tpu.memory_space<vmem>>, %arg7: memref<1x32x32xf32, #tpu.memory_space<vmem>>, %arg8: memref<1x1x32xf32, #tpu.memory_space<vmem>>, %arg9: memref<1x32x32xf32, #tpu.memory_space<vmem>>, %arg10: memref<1x32xf32, #tpu.memory_space<vmem>>, %arg11: memref<1x8x32xf32, #tpu.memory_space<vmem>>, %arg12: memref<1x4x8x8xf32, #tpu.memory_space<vmem>>) attributes {dimension_semantics = [#tpu.dimension_semantics<parallel>, #tpu.dimension_semantics<arbitrary>], iteration_bounds = array<i64: 2, 1>, scalar_prefetch = 0 : i64, scratch_operands = 0 : i64, tpu.core_type = #tpu.core_type<tc>, window_params = [{transform_indices = @transform_0, window_bounds = array<i64: 1, 8, 32>}, {transform_indices = @transform_1, window_bounds = array<i64: 1, 32, 32>}, {transform_indices = @transform_2, window_bounds = array<i64: 1, 1, 32>}, {transform_indices = @transform_3, window_bounds = array<i64: 1, 32, 32>}, {transform_indices = @transform_4, window_bounds = array<i64: 1, 1, 32>}, {transform_indices = @transform_5, window_bounds = array<i64: 1, 32, 32>}, {transform_indices = @transform_6, window_bounds = array<i64: 1, 1, 32>}, {transform_indices = @transform_7, window_bounds = array<i64: 1, 32, 32>}, {pipeline_mode = #tpu.pipeline_mode<synchronous>, transform_indices = @transform_8, window_bounds = array<i64: 1, 32>}, {transform_indices = @transform_9, window_bounds = array<i64: 1, 8, 32>}, {transform_indices = @transform_10, window_bounds = array<i64: 1, 4, 8, 8>}]} {
    %c0 = arith.constant 0 : index
    %c0_0 = arith.constant 0 : index
    %c0_1 = arith.constant 0 : index
    %0 = vector.load %arg2[%c0, %c0_0, %c0_1] : memref<1x8x32xf32, #tpu.memory_space<vmem>>, vector<1x8x32xf32>
    %1 = vector.shape_cast %0 : vector<1x8x32xf32> to vector<8x32xf32>
    %c0_2 = arith.constant 0 : index
    %c0_3 = arith.constant 0 : index
    %c0_4 = arith.constant 0 : index
    %2 = vector.load %arg3[%c0_2, %c0_3, %c0_4] : memref<1x32x32xf32, #tpu.memory_space<vmem>>, vector<1x32x32xf32>
    %3 = vector.shape_cast %2 : vector<1x32x32xf32> to vector<32x32xf32>
    %cst = arith.constant dense<0.000000e+00> : vector<8x32xf32>
    %4 = tpu.matmul %1, %3, %cst {dimension_numbers = #tpu.dot_dimension_numbers<[1], [0], [0], [1], [0, 0, 1, 1], [], []>} : vector<8x32xf32>, vector<32x32xf32>, vector<8x32xf32> -> vector<8x32xf32>
    %c0_5 = arith.constant 0 : index
    %c0_6 = arith.constant 0 : index
    %c0_7 = arith.constant 0 : index
    %5 = vector.load %arg4[%c0_5, %c0_6, %c0_7] : memref<1x1x32xf32, #tpu.memory_space<vmem>>, vector<1x1x32xf32>
    %6 = vector.shape_cast %5 : vector<1x1x32xf32> to vector<1x32xf32>
    %7 = vector.broadcast %6 : vector<1x32xf32> to vector<8x32xf32>
    %8 = arith.addf %4, %7 : vector<8x32xf32>
    %cst_8 = arith.constant 0.353553385 : f32
    %9 = vector.broadcast %cst_8 : f32 to vector<8x32xf32>
    %10 = arith.mulf %8, %9 : vector<8x32xf32>
    %c0_9 = arith.constant 0 : index
    %c0_10 = arith.constant 0 : index
    %c0_11 = arith.constant 0 : index
    %11 = vector.load %arg5[%c0_9, %c0_10, %c0_11] : memref<1x32x32xf32, #tpu.memory_space<vmem>>, vector<1x32x32xf32>
    %12 = vector.shape_cast %11 : vector<1x32x32xf32> to vector<32x32xf32>
    %cst_12 = arith.constant dense<0.000000e+00> : vector<8x32xf32>
    %13 = tpu.matmul %1, %12, %cst_12 {dimension_numbers = #tpu.dot_dimension_numbers<[1], [0], [0], [1], [0, 0, 1, 1], [], []>} : vector<8x32xf32>, vector<32x32xf32>, vector<8x32xf32> -> vector<8x32xf32>
    %c0_13 = arith.constant 0 : index
    %c0_14 = arith.constant 0 : index
    %c0_15 = arith.constant 0 : index
    %14 = vector.load %arg6[%c0_13, %c0_14, %c0_15] : memref<1x1x32xf32, #tpu.memory_space<vmem>>, vector<1x1x32xf32>
    %15 = vector.shape_cast %14 : vector<1x1x32xf32> to vector<1x32xf32>
    %16 = vector.broadcast %15 : vector<1x32xf32> to vector<8x32xf32>
    %17 = arith.addf %13, %16 : vector<8x32xf32>
    %c0_16 = arith.constant 0 : index
    %c0_17 = arith.constant 0 : index
    %c0_18 = arith.constant 0 : index
    %18 = vector.load %arg7[%c0_16, %c0_17, %c0_18] : memref<1x32x32xf32, #tpu.memory_space<vmem>>, vector<1x32x32xf32>
    %19 = vector.shape_cast %18 : vector<1x32x32xf32> to vector<32x32xf32>
    %cst_19 = arith.constant dense<0.000000e+00> : vector<8x32xf32>
    %20 = tpu.matmul %1, %19, %cst_19 {dimension_numbers = #tpu.dot_dimension_numbers<[1], [0], [0], [1], [0, 0, 1, 1], [], []>} : vector<8x32xf32>, vector<32x32xf32>, vector<8x32xf32> -> vector<8x32xf32>
    %c0_20 = arith.constant 0 : index
    %c0_21 = arith.constant 0 : index
    %c0_22 = arith.constant 0 : index
    %21 = vector.load %arg8[%c0_20, %c0_21, %c0_22] : memref<1x1x32xf32, #tpu.memory_space<vmem>>, vector<1x1x32xf32>
    %22 = vector.shape_cast %21 : vector<1x1x32xf32> to vector<1x32xf32>
    %23 = vector.broadcast %22 : vector<1x32xf32> to vector<8x32xf32>
    %24 = arith.addf %20, %23 : vector<8x32xf32>
    %c0_23 = arith.constant 0 : index
    %c0_24 = arith.constant 0 : index
    %c0_25 = arith.constant 0 : index
    %25 = vector.load %arg9[%c0_23, %c0_24, %c0_25] : memref<1x32x32xf32, #tpu.memory_space<vmem>>, vector<1x32x32xf32>
    %26 = vector.shape_cast %25 : vector<1x32x32xf32> to vector<32x32xf32>
    %c0_i32 = arith.constant 0 : i32
    %27 = arith.cmpi eq, %arg1, %c0_i32 : i32
    %28 = arith.extui %27 : i1 to i32
    %c0_i32_26 = arith.constant 0 : i32
    %29 = arith.cmpi ne, %28, %c0_i32_26 : i32
    scf.if %29 {
      %c0_67 = arith.constant 0 : index
      %c0_68 = arith.constant 0 : index
      %117 = vector.load %arg10[%c0_67, %c0_68] : memref<1x32xf32, #tpu.memory_space<vmem>>, vector<1x32xf32>
      %118 = vector.shape_cast %117 : vector<1x32xf32> to vector<1x32xf32>
      %119 = vector.broadcast %118 : vector<1x32xf32> to vector<8x32xf32>
      %c0_69 = arith.constant 0 : index
      %c0_70 = arith.constant 0 : index
      %c0_71 = arith.constant 0 : index
      %120 = vector.load %arg11[%c0_69, %c0_70, %c0_71] : memref<1x8x32xf32, #tpu.memory_space<vmem>>, vector<1x8x32xf32>
      %121 = vector.shape_cast %120 : vector<1x8x32xf32> to vector<8x32xf32>
      %122 = vector.shape_cast %119 : vector<8x32xf32> to vector<1x8x32xf32>
      tpu.vector_store %arg11[%c0_69, %c0_70, %c0_71], %122 {strides = array<i32>} : memref<1x8x32xf32, #tpu.memory_space<vmem>>, vector<1x8x32xf32>,
    } else {
    }
    %cst_27 = arith.constant 0.000000e+00 : f32
    %30 = vector.broadcast %cst_27 : f32 to vector<8x32xf32>
    %31 = vector.extract_strided_slice %10 {offsets = [0, 0], sizes = [8, 8], strides = [1, 1]} : vector<8x32xf32> to vector<8x8xf32>
    %32 = vector.extract_strided_slice %17 {offsets = [0, 0], sizes = [8, 8], strides = [1, 1]} : vector<8x32xf32> to vector<8x8xf32>
    %cst_28 = arith.constant dense<0.000000e+00> : vector<8x8xf32>
    %33 = tpu.matmul %31, %32, %cst_28 {dimension_numbers = #tpu.dot_dimension_numbers<[1], [1], [0], [0], [0, 0, 1, 0], [], []>} : vector<8x8xf32>, vector<8x8xf32>, vector<8x8xf32> -> vector<8x8xf32>
    %cst_29 = arith.constant dense<0xFF800000> : vector<8xf32>
    %34 = vector.multi_reduction <maximumf>, %33, %cst_29 [1] : vector<8x8xf32> to vector<8xf32>
    %35 = vector.shape_cast %34 : vector<8xf32> to vector<8x1xf32>
    %36 = vector.broadcast %35 : vector<8x1xf32> to vector<8x8xf32>
    %37 = arith.subf %33, %36 : vector<8x8xf32>
    %38 = math.exp %37 : vector<8x8xf32>
    %cst_30 = arith.constant dense<0.000000e+00> : vector<8xf32>
    %39 = vector.multi_reduction <add>, %38, %cst_30 [1] : vector<8x8xf32> to vector<8xf32>
    %40 = vector.shape_cast %39 : vector<8xf32> to vector<8x1xf32>
    %41 = vector.broadcast %40 : vector<8x1xf32> to vector<8x8xf32>
    %42 = arith.divf %38, %41 : vector<8x8xf32>
    %c0_31 = arith.constant 0 : index
    %c0_32 = arith.constant 0 : index
    %c0_33 = arith.constant 0 : index
    %c0_34 = arith.constant 0 : index
    %43 = vector.load %arg12[%c0_31, %c0_32, %c0_33, %c0_34] : memref<1x4x8x8xf32, #tpu.memory_space<vmem>>, vector<1x1x8x8xf32>
    %44 = vector.shape_cast %43 : vector<1x1x8x8xf32> to vector<8x8xf32>
    %45 = vector.shape_cast %42 : vector<8x8xf32> to vector<1x1x8x8xf32>
    tpu.vector_store %arg12[%c0_31, %c0_32, %c0_33, %c0_34], %45 {strides = array<i32>} : memref<1x4x8x8xf32, #tpu.memory_space<vmem>>, vector<1x1x8x8xf32>,
    %46 = vector.extract_strided_slice %24 {offsets = [0, 0], sizes = [8, 8], strides = [1, 1]} : vector<8x32xf32> to vector<8x8xf32>
    %cst_35 = arith.constant dense<0.000000e+00> : vector<8x8xf32>
    %47 = tpu.matmul %42, %46, %cst_35 {dimension_numbers = #tpu.dot_dimension_numbers<[1], [0], [0], [1], [0, 0, 1, 1], [], []>} : vector<8x8xf32>, vector<8x8xf32>, vector<8x8xf32> -> vector<8x8xf32>
    %48 = vector.extract_strided_slice %26 {offsets = [0, 0], sizes = [8, 32], strides = [1, 1]} : vector<32x32xf32> to vector<8x32xf32>
    %cst_36 = arith.constant dense<0.000000e+00> : vector<8x32xf32>
    %49 = tpu.matmul %47, %48, %cst_36 {dimension_numbers = #tpu.dot_dimension_numbers<[1], [0], [0], [1], [0, 0, 1, 1], [], []>} : vector<8x8xf32>, vector<8x32xf32>, vector<8x32xf32> -> vector<8x32xf32>
    %50 = arith.addf %30, %49 : vector<8x32xf32>
    %51 = vector.extract_strided_slice %10 {offsets = [0, 8], sizes = [8, 8], strides = [1, 1]} : vector<8x32xf32> to vector<8x8xf32>
    %52 = vector.extract_strided_slice %17 {offsets = [0, 8], sizes = [8, 8], strides = [1, 1]} : vector<8x32xf32> to vector<8x8xf32>
    %cst_37 = arith.constant dense<0.000000e+00> : vector<8x8xf32>
    %53 = tpu.matmul %51, %52, %cst_37 {dimension_numbers = #tpu.dot_dimension_numbers<[1], [1], [0], [0], [0, 0, 1, 0], [], []>} : vector<8x8xf32>, vector<8x8xf32>, vector<8x8xf32> -> vector<8x8xf32>
    %cst_38 = arith.constant dense<0xFF800000> : vector<8xf32>
    %54 = vector.multi_reduction <maximumf>, %53, %cst_38 [1] : vector<8x8xf32> to vector<8xf32>
    %55 = vector.shape_cast %54 : vector<8xf32> to vector<8x1xf32>
    %56 = vector.broadcast %55 : vector<8x1xf32> to vector<8x8xf32>
    %57 = arith.subf %53, %56 : vector<8x8xf32>
    %58 = math.exp %57 : vector<8x8xf32>
    %cst_39 = arith.constant dense<0.000000e+00> : vector<8xf32>
    %59 = vector.multi_reduction <add>, %58, %cst_39 [1] : vector<8x8xf32> to vector<8xf32>
    %60 = vector.shape_cast %59 : vector<8xf32> to vector<8x1xf32>
    %61 = vector.broadcast %60 : vector<8x1xf32> to vector<8x8xf32>
    %62 = arith.divf %58, %61 : vector<8x8xf32>
    %c0_40 = arith.constant 0 : index
    %c1 = arith.constant 1 : index
    %c0_41 = arith.constant 0 : index
    %c0_42 = arith.constant 0 : index
    %63 = vector.load %arg12[%c0_40, %c1, %c0_41, %c0_42] : memref<1x4x8x8xf32, #tpu.memory_space<vmem>>, vector<1x1x8x8xf32>
    %64 = vector.shape_cast %63 : vector<1x1x8x8xf32> to vector<8x8xf32>
    %65 = vector.shape_cast %62 : vector<8x8xf32> to vector<1x1x8x8xf32>
    tpu.vector_store %arg12[%c0_40, %c1, %c0_41, %c0_42], %65 {strides = array<i32>} : memref<1x4x8x8xf32, #tpu.memory_space<vmem>>, vector<1x1x8x8xf32>,
    %66 = vector.extract_strided_slice %24 {offsets = [0, 8], sizes = [8, 8], strides = [1, 1]} : vector<8x32xf32> to vector<8x8xf32>
    %cst_43 = arith.constant dense<0.000000e+00> : vector<8x8xf32>
    %67 = tpu.matmul %62, %66, %cst_43 {dimension_numbers = #tpu.dot_dimension_numbers<[1], [0], [0], [1], [0, 0, 1, 1], [], []>} : vector<8x8xf32>, vector<8x8xf32>, vector<8x8xf32> -> vector<8x8xf32>
    %68 = vector.extract_strided_slice %26 {offsets = [8, 0], sizes = [8, 32], strides = [1, 1]} : vector<32x32xf32> to vector<8x32xf32>
    %cst_44 = arith.constant dense<0.000000e+00> : vector<8x32xf32>
    %69 = tpu.matmul %67, %68, %cst_44 {dimension_numbers = #tpu.dot_dimension_numbers<[1], [0], [0], [1], [0, 0, 1, 1], [], []>} : vector<8x8xf32>, vector<8x32xf32>, vector<8x32xf32> -> vector<8x32xf32>
    %70 = arith.addf %50, %69 : vector<8x32xf32>
    %71 = vector.extract_strided_slice %10 {offsets = [0, 16], sizes = [8, 8], strides = [1, 1]} : vector<8x32xf32> to vector<8x8xf32>
    %72 = vector.extract_strided_slice %17 {offsets = [0, 16], sizes = [8, 8], strides = [1, 1]} : vector<8x32xf32> to vector<8x8xf32>
    %cst_45 = arith.constant dense<0.000000e+00> : vector<8x8xf32>
    %73 = tpu.matmul %71, %72, %cst_45 {dimension_numbers = #tpu.dot_dimension_numbers<[1], [1], [0], [0], [0, 0, 1, 0], [], []>} : vector<8x8xf32>, vector<8x8xf32>, vector<8x8xf32> -> vector<8x8xf32>
    %cst_46 = arith.constant dense<0xFF800000> : vector<8xf32>
    %74 = vector.multi_reduction <maximumf>, %73, %cst_46 [1] : vector<8x8xf32> to vector<8xf32>
    %75 = vector.shape_cast %74 : vector<8xf32> to vector<8x1xf32>
    %76 = vector.broadcast %75 : vector<8x1xf32> to vector<8x8xf32>
    %77 = arith.subf %73, %76 : vector<8x8xf32>
    %78 = math.exp %77 : vector<8x8xf32>
    %cst_47 = arith.constant dense<0.000000e+00> : vector<8xf32>
    %79 = vector.multi_reduction <add>, %78, %cst_47 [1] : vector<8x8xf32> to vector<8xf32>
    %80 = vector.shape_cast %79 : vector<8xf32> to vector<8x1xf32>
    %81 = vector.broadcast %80 : vector<8x1xf32> to vector<8x8xf32>
    %82 = arith.divf %78, %81 : vector<8x8xf32>
    %c0_48 = arith.constant 0 : index
    %c2 = arith.constant 2 : index
    %c0_49 = arith.constant 0 : index
    %c0_50 = arith.constant 0 : index
    %83 = vector.load %arg12[%c0_48, %c2, %c0_49, %c0_50] : memref<1x4x8x8xf32, #tpu.memory_space<vmem>>, vector<1x1x8x8xf32>
    %84 = vector.shape_cast %83 : vector<1x1x8x8xf32> to vector<8x8xf32>
    %85 = vector.shape_cast %82 : vector<8x8xf32> to vector<1x1x8x8xf32>
    tpu.vector_store %arg12[%c0_48, %c2, %c0_49, %c0_50], %85 {strides = array<i32>} : memref<1x4x8x8xf32, #tpu.memory_space<vmem>>, vector<1x1x8x8xf32>,
    %86 = vector.extract_strided_slice %24 {offsets = [0, 16], sizes = [8, 8], strides = [1, 1]} : vector<8x32xf32> to vector<8x8xf32>
    %cst_51 = arith.constant dense<0.000000e+00> : vector<8x8xf32>
    %87 = tpu.matmul %82, %86, %cst_51 {dimension_numbers = #tpu.dot_dimension_numbers<[1], [0], [0], [1], [0, 0, 1, 1], [], []>} : vector<8x8xf32>, vector<8x8xf32>, vector<8x8xf32> -> vector<8x8xf32>
    %88 = vector.extract_strided_slice %26 {offsets = [16, 0], sizes = [8, 32], strides = [1, 1]} : vector<32x32xf32> to vector<8x32xf32>
    %cst_52 = arith.constant dense<0.000000e+00> : vector<8x32xf32>
    %89 = tpu.matmul %87, %88, %cst_52 {dimension_numbers = #tpu.dot_dimension_numbers<[1], [0], [0], [1], [0, 0, 1, 1], [], []>} : vector<8x8xf32>, vector<8x32xf32>, vector<8x32xf32> -> vector<8x32xf32>
    %90 = arith.addf %70, %89 : vector<8x32xf32>
    %91 = vector.extract_strided_slice %10 {offsets = [0, 24], sizes = [8, 8], strides = [1, 1]} : vector<8x32xf32> to vector<8x8xf32>
    %92 = vector.extract_strided_slice %17 {offsets = [0, 24], sizes = [8, 8], strides = [1, 1]} : vector<8x32xf32> to vector<8x8xf32>
    %cst_53 = arith.constant dense<0.000000e+00> : vector<8x8xf32>
    %93 = tpu.matmul %91, %92, %cst_53 {dimension_numbers = #tpu.dot_dimension_numbers<[1], [1], [0], [0], [0, 0, 1, 0], [], []>} : vector<8x8xf32>, vector<8x8xf32>, vector<8x8xf32> -> vector<8x8xf32>
    %cst_54 = arith.constant dense<0xFF800000> : vector<8xf32>
    %94 = vector.multi_reduction <maximumf>, %93, %cst_54 [1] : vector<8x8xf32> to vector<8xf32>
    %95 = vector.shape_cast %94 : vector<8xf32> to vector<8x1xf32>
    %96 = vector.broadcast %95 : vector<8x1xf32> to vector<8x8xf32>
    %97 = arith.subf %93, %96 : vector<8x8xf32>
    %98 = math.exp %97 : vector<8x8xf32>
    %cst_55 = arith.constant dense<0.000000e+00> : vector<8xf32>
    %99 = vector.multi_reduction <add>, %98, %cst_55 [1] : vector<8x8xf32> to vector<8xf32>
    %100 = vector.shape_cast %99 : vector<8xf32> to vector<8x1xf32>
    %101 = vector.broadcast %100 : vector<8x1xf32> to vector<8x8xf32>
    %102 = arith.divf %98, %101 : vector<8x8xf32>
    %c0_56 = arith.constant 0 : index
    %c3 = arith.constant 3 : index
    %c0_57 = arith.constant 0 : index
    %c0_58 = arith.constant 0 : index
    %103 = vector.load %arg12[%c0_56, %c3, %c0_57, %c0_58] : memref<1x4x8x8xf32, #tpu.memory_space<vmem>>, vector<1x1x8x8xf32>
    %104 = vector.shape_cast %103 : vector<1x1x8x8xf32> to vector<8x8xf32>
    %105 = vector.shape_cast %102 : vector<8x8xf32> to vector<1x1x8x8xf32>
    tpu.vector_store %arg12[%c0_56, %c3, %c0_57, %c0_58], %105 {strides = array<i32>} : memref<1x4x8x8xf32, #tpu.memory_space<vmem>>, vector<1x1x8x8xf32>,
    %106 = vector.extract_strided_slice %24 {offsets = [0, 24], sizes = [8, 8], strides = [1, 1]} : vector<8x32xf32> to vector<8x8xf32>
    %cst_59 = arith.constant dense<0.000000e+00> : vector<8x8xf32>
    %107 = tpu.matmul %102, %106, %cst_59 {dimension_numbers = #tpu.dot_dimension_numbers<[1], [0], [0], [1], [0, 0, 1, 1], [], []>} : vector<8x8xf32>, vector<8x8xf32>, vector<8x8xf32> -> vector<8x8xf32>
    %108 = vector.extract_strided_slice %26 {offsets = [24, 0], sizes = [8, 32], strides = [1, 1]} : vector<32x32xf32> to vector<8x32xf32>
    %cst_60 = arith.constant dense<0.000000e+00> : vector<8x32xf32>
    %109 = tpu.matmul %107, %108, %cst_60 {dimension_numbers = #tpu.dot_dimension_numbers<[1], [0], [0], [1], [0, 0, 1, 1], [], []>} : vector<8x8xf32>, vector<8x32xf32>, vector<8x32xf32> -> vector<8x32xf32>
    %110 = arith.addf %90, %109 : vector<8x32xf32>
    %c0_61 = arith.constant 0 : index
    %c0_62 = arith.constant 0 : index
    %c0_63 = arith.constant 0 : index
    %111 = vector.load %arg11[%c0_61, %c0_62, %c0_63] : memref<1x8x32xf32, #tpu.memory_space<vmem>>, vector<1x8x32xf32>
    %112 = vector.shape_cast %111 : vector<1x8x32xf32> to vector<8x32xf32>
    %113 = arith.addf %112, %110 : vector<8x32xf32>
    %c0_64 = arith.constant 0 : index
    %c0_65 = arith.constant 0 : index
    %c0_66 = arith.constant 0 : index
    %114 = vector.load %arg11[%c0_64, %c0_65, %c0_66] : memref<1x8x32xf32, #tpu.memory_space<vmem>>, vector<1x8x32xf32>
    %115 = vector.shape_cast %114 : vector<1x8x32xf32> to vector<8x32xf32>
    %116 = vector.shape_cast %113 : vector<8x32xf32> to vector<1x8x32xf32>
    tpu.vector_store %arg11[%c0_64, %c0_65, %c0_66], %116 {strides = array<i32>} : memref<1x8x32xf32, #tpu.memory_space<vmem>>, vector<1x8x32xf32>,
    return
  }
  func.func @transform_0(%arg0: i32, %arg1: i32) -> (i32, i32, i32) {
    %c0_i32 = arith.constant 0 : i32
    %c0_i32_0 = arith.constant 0 : i32
    %c0_i32_1 = arith.constant 0 : i32
    return %arg0, %c0_i32, %c0_i32_0 : i32, i32, i32
  }
  func.func @transform_1(%arg0: i32, %arg1: i32) -> (i32, i32, i32) {
    %c0_i32 = arith.constant 0 : i32
    %c0_i32_0 = arith.constant 0 : i32
    %c0_i32_1 = arith.constant 0 : i32
    return %arg1, %c0_i32, %c0_i32_0 : i32, i32, i32
  }
  func.func @transform_2(%arg0: i32, %arg1: i32) -> (i32, i32, i32) {
    %c0_i32 = arith.constant 0 : i32
    %c0_i32_0 = arith.constant 0 : i32
    %c0_i32_1 = arith.constant 0 : i32
    return %arg1, %c0_i32, %c0_i32_0 : i32, i32, i32
  }
  func.func @transform_3(%arg0: i32, %arg1: i32) -> (i32, i32, i32) {
    %c0_i32 = arith.constant 0 : i32
    %c0_i32_0 = arith.constant 0 : i32
    %c0_i32_1 = arith.constant 0 : i32
    return %arg1, %c0_i32, %c0_i32_0 : i32, i32, i32
  }
  func.func @transform_4(%arg0: i32, %arg1: i32) -> (i32, i32, i32) {
    %c0_i32 = arith.constant 0 : i32
    %c0_i32_0 = arith.constant 0 : i32
    %c0_i32_1 = arith.constant 0 : i32
    return %arg1, %c0_i32, %c0_i32_0 : i32, i32, i32
  }
  func.func @transform_5(%arg0: i32, %arg1: i32) -> (i32, i32, i32) {
    %c0_i32 = arith.constant 0 : i32
    %c0_i32_0 = arith.constant 0 : i32
    %c0_i32_1 = arith.constant 0 : i32
    return %arg1, %c0_i32, %c0_i32_0 : i32, i32, i32
  }
  func.func @transform_6(%arg0: i32, %arg1: i32) -> (i32, i32, i32) {
    %c0_i32 = arith.constant 0 : i32
    %c0_i32_0 = arith.constant 0 : i32
    %c0_i32_1 = arith.constant 0 : i32
    return %arg1, %c0_i32, %c0_i32_0 : i32, i32, i32
  }
  func.func @transform_7(%arg0: i32, %arg1: i32) -> (i32, i32, i32) {
    %c0_i32 = arith.constant 0 : i32
    %c0_i32_0 = arith.constant 0 : i32
    %c0_i32_1 = arith.constant 0 : i32
    return %arg1, %c0_i32, %c0_i32_0 : i32, i32, i32
  }
  func.func @transform_8(%arg0: i32, %arg1: i32) -> (i32, i32) {
    %c0_i32 = arith.constant 0 : i32
    %c0_i32_0 = arith.constant 0 : i32
    %c0_i32_1 = arith.constant 0 : i32
    return %c0_i32, %c0_i32_0 : i32, i32
  }
  func.func @transform_9(%arg0: i32, %arg1: i32) -> (i32, i32, i32) {
    %c0_i32 = arith.constant 0 : i32
    %c0_i32_0 = arith.constant 0 : i32
    %c0_i32_1 = arith.constant 0 : i32
    return %arg0, %c0_i32, %c0_i32_0 : i32, i32, i32
  }
  func.func @transform_10(%arg0: i32, %arg1: i32) -> (i32, i32, i32, i32) {
    %c0_i32 = arith.constant 0 : i32
    %c0_i32_0 = arith.constant 0 : i32
    %c0_i32_1 = arith.constant 0 : i32
    return %arg0, %arg1, %c0_i32, %c0_i32_0 : i32, i32, i32, i32
  }
}

</mosaic_0001>

<bundles_post_ra>
// kernel: tpu_custom_call.1
= control target key start
LH: loop header
LB: loop body
LE: loop exit
PB: predicated region body
PF: predicated region fallthrough
CT: control target
= control target key end

     0   :  { %s2077_s0 = inlined_call_operand.hbm [shape: f32[2,8,32], index: 0, kind: input, shape index: {}]   ;;  %s2078_s1 = inlined_call_operand.hbm [shape: f32[1,32,32], index: 1, kind: input, shape index: {}]   ;;  %s2079_s2 = inlined_call_operand.vmem [shape: f32[1,1,32], index: 2, kind: input, shape index: {}]   ;;  %s2080_s3 = inlined_call_operand.hbm [shape: f32[1,32,32], index: 3, kind: input, shape index: {}]   ;;  %s2081_s4 = inlined_call_operand.vmem [shape: f32[1,1,32], index: 4, kind: input, shape index: {}]   ;;  %s2082_s5 = inlined_call_operand.hbm [shape: f32[1,32,32], index: 5, kind: input, shape index: {}]   ;;  %s2083_s6 = inlined_call_operand.vmem [shape: f32[1,1,32], index: 6, kind: input, shape index: {}]   ;;  %s2084_s7 = inlined_call_operand.hbm [shape: f32[1,32,32], index: 7, kind: input, shape index: {}]   ;;  %s2085_s8 = inlined_call_operand.vmem [shape: f32[1,32], index: 8, kind: input, shape index: {}]   ;;  %s2086_s9 = inlined_call_operand.hbm [shape: f32[2,8,32], index: 9, kind: output, shape index: {0}]   ;;  %s2087_s10 = inlined_call_operand.hbm [shape: f32[2,4,8,8], index: 10, kind: output, shape index: {1}]  }
   0x1   :  { %2090 = sst [smem:[#allocation19_spill]] %s2077_s0 }
   0x2   :  { %2091 = sst [smem:[#allocation20_spill]] %s2078_s1 }
   0x3   :  { %2092 = sst [smem:[#allocation21_spill]] %s2079_s2 }
   0x4   :  { %2093 = sst [smem:[#allocation22_spill]] %s2080_s3 }
   0x5   :  { %2094 = sst [smem:[#allocation23_spill]] %s2082_s5 }
   0x6   :  { %2095 = sst [smem:[#allocation24_spill]] %s2084_s7 }
   0x7   :  { %16 = vsyncpa [#allocation3], 0 }
   0x8   :  { %18 = vsyncpa [#allocation3 + $0x1], 0 }
   0x9   :  { %19 = vsyncpa [#allocation6], 0 }
   0xa   :  { %20 = vsyncpa [#allocation9], 0 }
   0xb   :  { %21 = vsyncpa [#allocation4], 0 }
   0xc   :  { %23 = vsyncpa [#allocation4 + $0x1], 0 }
   0xd   :  { %24 = vsyncpa [#allocation13], 0 }
   0xe   :  { %26 = vsyncpa [#allocation13 + $0x1], 0  ;;  %s1821_s13 = smov 0   ;;  %s1823_s14 = smov 0  }
   0xf   :  { %s1825_s15 = smov 0   ;;  %s1827_s16 = smov 0  }
  0x10   :  { %s1829_s17 = smov 0   ;;  %s1831_s18 = smov 0  }
  0x11 LB: > { %s2088_s19 = sadd.s32 4294967295, %s1753_s18   ;;  %p1297_p0 = scmp.ge.s32.totalorder %s1753_s18, 1  ;;  %s1753_s18 = sphi %s1831_s18, %s32_s18   ;;  %s1749_s17 = sphi %s1829_s17, %s2114_s17   ;;  %s1745_s16 = sphi %s1827_s16, %s2113_s16   ;;  %s1741_s15 = sphi %s1825_s15, %s2112_s15   ;;  %s1737_s14 = sphi %s1823_s14, %s2111_s14   ;;  %s1733_s13 = sphi %s1821_s13, %s2110_s13  }
  0x12   : > { %p1855_p1 = scmp.eq.s32.totalorder %s2088_s19, 0  ;;  %p332_p2 = scmp.lt.s32.totalorder %s1753_s18, 3 }
  0x13   : > { %s2097_s1 = sld [smem:[#allocation20_spill]]  ;;  %s1755_s25 = smov [#allocation5]  }
  0x14   : > { %p1863_p3 = pnand %p1297_p0, %p332_p2  ;;  %s348_s26 = sshll.u32 %s1755_s25, 4  ;;  %s349_s26 = int_to_ptr.vmem [resolvable:$true] %s348_s26 }
  0x15   : > { %p1305_p6 = scmp.ge.s32.totalorder %s1753_s18, 2  ;;  %s2100_s5 = sld [smem:[#allocation23_spill]] }
  0x16   : > { %p1368_p4 = pneg %p1863_p3  ;;  %s1756_s11 = smov 128  }
  0x17   : > { %s1757_s12 = smov 8   ;;  %s1758_s21 = smov [#allocation8]  }
  0x18   : > { %p1871_p5 = pnand %p1368_p4, %p1855_p1  ;;  %s394_s22 = sshll.u32 %s1758_s21, 4  ;;  %s395_s22 = int_to_ptr.vmem [resolvable:$true] %s394_s22 }
  0x19   : > { %s346_s23 = sshll.u32 %s2097_s1, 4  ;;  %s2101_s3 = sld [smem:[#allocation22_spill]]  ;;  %s347_s23 = int_to_ptr.hbm [resolvable:$true] %s346_s23 }
  0x1a   : > { %1371 = dma.hbm_to_vmem [thread:$0]  (!%p1871_p5), %s347_s23, 512, %s349_s26, [#allocation6], %s1756_s11, %s1756_s11, %s1757_s12  }
  0x1b   : > { %s392_s30 = sshll.u32 %s2100_s5, 4  ;;  %s2102_s7 = sld [smem:[#allocation24_spill]]  ;;  %s393_s30 = int_to_ptr.hbm [resolvable:$true] %s392_s30 }
  0x1c   : > { %1377 = dma.hbm_to_vmem [thread:$0]  (!%p1871_p5), %s393_s30, 512, %s395_s22, [#allocation9], %s1756_s11, %s1756_s11, %s1757_s12  }
  0x1d   : > { %s1759_s26 = smov [#allocation7]   ;;  %s1760_s19 = smov [#allocation10]  }
  0x1e   : > { %s371_s21 = sshll.u32 %s1759_s26, 4  ;;  %s417_s25 = sshll.u32 %s1760_s19, 4  ;;  %s372_s21 = int_to_ptr.vmem [resolvable:$true] %s371_s21  ;;  %s418_s25 = int_to_ptr.vmem [resolvable:$true] %s417_s25 }
  0x1f   : > { %s369_s1 = sshll.u32 %s2101_s3, 4  ;;  %s44_s30 = sadd.s32 1, %s1749_s17  ;;  %s370_s1 = int_to_ptr.hbm [resolvable:$true] %s369_s1 }
  0x20   : > { %1374 = dma.hbm_to_vmem [thread:$0]  (!%p1871_p5), %s370_s1, 512, %s372_s21, [#allocation6], %s1756_s11, %s1756_s11, %s1757_s12  }
  0x21   : > { %s415_s23 = sshll.u32 %s2102_s7, 4  ;;  %s1296_s22 = sadd.s32 4294967294, %s1753_s18   ;;  %s416_s23 = int_to_ptr.hbm [resolvable:$true] %s415_s23 }
  0x22   : > { %1380 = dma.hbm_to_vmem [thread:$0]  (!%p1871_p5), %s416_s23, 512, %s418_s25, [#allocation9], %s1756_s11, %s1756_s11, %s1757_s12  }
  0x23   : > { %p46_p7 = scmp.ge.s32.totalorder %s44_s30, 2  ;;  %s51_s28 = sadd.s32 1, %s1741_s15 }
  0x24   : > { %p58_p8 = scmp.ne.s32.totalorder %s1741_s15, %s1737_s14  ;;  %p59_p9 = scmp.eq.s32.totalorder %s1753_s18, 0 }
  0x25   : > { %s2116_s30 = smov (%p46_p7, %s44_s30), 0  ;;  %p64_p10 = scmp.ne.s32.totalorder %s1737_s14, %s1733_s13 }
  0x26   : > { %s48_s1 = ssub.s32 %s1749_s17, %s2116_s30  ;;  %s2103_s29 = sadd.s32 4294967295, %s1753_s18  }
  0x27   : > { %p291_p11 = scmp.eq.s32.totalorder %s2103_s29, 1  ;;  %p49_p12 = scmp.eq.s32.totalorder %s48_s1, 0 }
  0x28   : > { %p1909_p13 = por %p1855_p1, %p64_p10  ;;  %p297_p2 = scmp.eq.s32.totalorder %s1296_s22, 1 }
  0x29   : > { %p1913_p0 = por %p291_p11, %p58_p8  ;;  %p60_p4 = por %p59_p9, %p58_p8 }
  0x2a   : > { %s1918_s12 = scalar_select %p49_p12, %s1741_s15, %s51_s28  }
  0x2b   : > { %p1920_p5 = por %p297_p2, %p64_p10  ;;  %s434_s26 = sand.u32 1, %s1741_s15  }
  0x2c   : > { %s1307_s21 = sshll.u32 %s1749_s17, 3  ;;  %p1396_p7 = scmp.lt.s32.totalorder %s1753_s18, 2 }
  0x2d   : > { %s1306_s19 = sshll.u32 %s434_s26, 3  ;;  %s2107_s0 = sld [smem:[#allocation19_spill]] }
  0x2e   : > { %s438_s5 = scalar_lea.vmem [#allocation2], %s1306_s19  ;;  %p1382_p11 = pnand %p1396_p7, %p60_p4 }
  0x2f   : > { %s446_s7 = sshll.u32 %s438_s5, 4  ;;  %s435_s22 = scalar_lea.sflag [#allocation3], %s434_s26  ;;  %s447_s7 = int_to_ptr.vmem [resolvable:$true] %s446_s7 }
  0x30   : > { %s1933_s28 = sand.u32 (!%p1863_p3), 1, %s1737_s14  }
  0x31   : > { %455 = sbr.rel (%p1863_p3) target bundleno = 1404 (0x57c), region = 56  ;;  %s2089_s25 = sshll.u32 (!%p1863_p3), %s1933_s28, 3 }
  0x32   : > { %s461_s19 = scalar_lea.vmem (!%p1863_p3), [#allocation2], %s2089_s25 }
  0x33   : > { %s442_s29 = scalar_lea.hbm %s2107_s0, %s1307_s21  ;;  %s458_s21 = scalar_lea.sflag (!%p1863_p3), [#allocation3], %s1933_s28 }
  0x34   : > { %s444_s3 = sshll.u32 %s442_s29, 4  ;;  %s445_s3 = int_to_ptr.hbm [resolvable:$true] %s444_s3 }
  0x35   : > { %1384 = dma.hbm_to_vmem [thread:$0]  (!%p1382_p11), %s445_s3, 128, %s447_s7, %s435_s22  }
  0x36   : > { %1712 = dma.done.wait (%p1909_p13), %s458_s21, 128  }
  0x37   : > { %1714 = vsyncadd (%p1909_p13), %s458_s21, 4294967168 }
  0x38   : > { %1716 = dma.done.wait (%p1855_p1), [#allocation6], 1024  }
  0x39   : > { %1718 = vsyncadd (%p1855_p1), [#allocation6], 4294966272 }
  0x3a   : > { %1720 = dma.done.wait (%p1855_p1), [#allocation9], 1024  }
  0x3b   : > { %1722 = vsyncadd (%p1855_p1), [#allocation9], 4294966272  ;;  %v580_v0 = vld [vmem:[#allocation7 + $0x18] sm:$0xff]  ;;  %v579_v2 = vld [vmem:[#allocation7 + $0x10] sm:$0xff]  ;;  %vm552_vm0 = vcmask 261120   ;;  %s2108_s2 = sld [smem:[#allocation21_spill]] }
  0x3c   : > { %v547_v1 = vld [vmem:[#allocation5 + $0x18] sm:$0xff]  ;;  %597 = vmatpush.msra.mxu1 %v580_v0  ;;  %v546_v3 = vld [vmem:[#allocation5 + $0x10] sm:$0xff]  ;;  %v578_v4 = vld [vmem:[#allocation7 + $0x8] sm:$0xff]  ;;  %vm646_vm1 = vcmask 64512   ;;  %s1761_s24 = smov 112   ;;  %s1762_s27 = smov 120  }
  0x3d   : > { %568 = vmatpush.msra.mxu0 %v547_v1  ;;  %v545_v5 = vld [vmem:[#allocation5 + $0x8] sm:$0xff]  ;;  %v577_v6 = vld [vmem:[#allocation7] sm:$0xff]  ;;  %v543_v8 = vld [vmem:[%s461_s19] sm:$0xff]  ;;  %s1763_s26 = smov 104   ;;  %s1315_s22 = sshll.u32 %s1933_s28, 5 }
  0x3e   : > { %598 = vmatpush.msra.mxu1 %v579_v2  ;;  %v544_v7 = vld [vmem:[#allocation5] sm:$0xff]  ;;  %v1461_v9 = vld [vmem:[%s2081_s4] ss:$0 sm:$0xff]  ;;  %v608_v21 = vld [vmem:[#allocation8 + $0x18] sm:$0xff]  ;;  %s1982_s21 = scalar_lea.vmem [#allocation12], %s1315_s22  ;;  %s1345_s19 = sshll.u32 %s1745_s16, 5 }
  0x3f   : > { %569 = vmatpush.msra.mxu0 %v546_v3  ;;  %625 = vmatpush.msra.mxu2 %v608_v21  ;;  %v607_v22 = vld [vmem:[#allocation8 + $0x10] sm:$0xff]  ;;  %v606_v23 = vld [vmem:[#allocation8 + $0x8] sm:$0xff]  ;;  %v605_v24 = vld [vmem:[#allocation8] sm:$0xff]  ;;  %s1092_s7 = scalar_lea.hbm %s2087_s10, %s1345_s19  ;;  %s1093_s20 = sshll.u32 %s1982_s21, 4  ;;  %s1094_s20 = int_to_ptr.vmem [resolvable:$true] %s1093_s20 }
  0x40   : > { %599 = vmatpush.msra.mxu1 %v578_v4  ;;  %v1463_v33 = vld [vmem:[%s2083_s6] ss:$0 sm:$0xff]  ;;  %v633_v36 = vld [vmem:[#allocation10] sm:$0xff]  ;;  %s1651_s25 = scalar_lea.hbm %s2087_s10, 64 }
  0x41   : > { %570 = vmatpush.msra.mxu0 %v545_v5  ;;  %v1462_v10 = vld [vmem:[%s2108_s2] ss:$0 sm:$0xff]  ;;  %626 = vmatpush.msra.mxu2 %v607_v22 }
  0x42   : > { %600 = vmatpush.msra.mxu1 %v577_v6 }
  0x43   : > { %571 = vmatpush.msra.mxu0 %v544_v7  ;;  %1317 = vmatmul.msk.f32.vlgmr.msra.gmra.mxu1 %vm552_vm0, %v543_v8 }
  0x44   : > { %1316 = vmatmul.msk.f32.vlgmr.msra.gmra.mxu0 %vm552_vm0, %v543_v8  ;;  %627 = vmatpush.msra.mxu2 %v606_v23 }
  0x46   : > { %628 = vmatpush.msra.mxu2 %v605_v24 }
  0x47   : > { %1318 = vmatmul.msk.f32.vlgmr.msra.gmra.mxu2 %vm552_vm0, %v543_v8 }
  0xc0   : > { %v602_v11 = vpop.f32.mrf.mxu1 }
  0xc1   : > { %v573_v12 = vpop.f32.mrf.mxu0  ;;  %v603_v13 = vadd.f32 %v1461_v9, %v602_v11 }
  0xc2   : > { %v574_v14 = vadd.f32 %v1462_v10, %v573_v12 }
  0xc3   : > { %850 = vrot.lane.b32.xlu2 %v603_v13, %s1761_s24  ;;  %723 = vrot.lane.b32.xlu1 %v603_v13, %s1762_s27 }
  0xc4   : > { %v576_v15 = vmul.f32 0.35355338, %v574_v14  ;;  %1319 = vmatpush.xpose.msk.msra.mxu3 %vm646_vm1, %v603_v13 }
  0xc7   : > { %1320 = vmatmul.msk.f32.vlgmr.msra.gmra.mxu3 %vm646_vm1, %v576_v15 }
  0xca   : > { %v630_v34 = vpop.f32.mrf.mxu2 }
  0xcb   : > { %954 = vrot.lane.b32.xlu2 %v603_v13, %s1763_s26  ;;  %721 = vrot.lane.b32.xlu1 %v576_v15, %s1762_s27  ;;  %v1977_v35 = vadd.f32 %v1463_v33, %v630_v34  ;;  %v634_v34 = vld [vmem:[#allocation10 + $0x8] sm:$0xff] }
  0xcc   : > { %820 = vmatpush.msrb.mxu2 %v634_v34 }
  0xcd   : > { %716 = vmatpush.msrb.mxu3 %v1977_v35 }
  0xcf   : > { %843 = vmatpush.msra.mxu3 %v633_v36 }
  0xd3   : > { %952 = vrot.lane.b32.xlu1 %v576_v15, %s1763_s26 }
 0x11d   : > { %v851_v17 = vpop.permute.xlu2 %850 }
 0x125   : > { %v955_v32 = vpop.permute.xlu2 %954 }
 0x135   : > { %v724_v16 = vpop.permute.xlu1 %723 }
 0x136   : > { %1322 = vmatpush.xpose.msk.msrb.mxu0 %vm646_vm1, %v724_v16 }
 0x13a   : > { %1328 = vmatpush.xpose.msk.msra.mxu0 %vm646_vm1, %v851_v17 }
 0x13d   : > { %v722_v18 = vpop.permute.xlu1 %721 }
 0x13e   : > { %1323 = vmatmul.msk.f32.vlgmr.msrb.gmra.mxu0 %vm646_vm1, %v722_v18 }
 0x145   : > { %v953_v6 = vpop.permute.xlu1 %952 }
 0x14a   : > { %v670_v19 = vpop.f32.mrf.mxu3 }
 0x14b   : > { %v673_v20 = vsel %vm646_vm1, %v670_v19, -inf }
 0x14c   : > { %674 = vmax.xlane.f32.xlu0 %v673_v20 }
 0x1bb   : > { %v746_v25 = vpop.f32.mrf.mxu0 }
 0x1bc   : > { %v749_v26 = vsel %vm646_vm1, %v746_v25, -inf }
 0x1bd   : > { %750 = vmax.xlane.f32.xlu2 %v749_v26 }
 0x1bf   : > { %v675_v27 = vpop.xlane.xlu0 %674 }
 0x1c0   : > { %v676_v28 = vsub.f32 %v670_v19, %v675_v27 }
 0x1c2   : > { %v677_v29 = vmul.f32 1.442695, %v676_v28 }
 0x1c4   : > { %1465 = vpow2.f32 %v677_v29 }
 0x1ca   : > { %v1466_v30 = vpop.eup %1465 }
 0x1cb   : > { %v679_v31 = vsel %vm646_vm1, %v1466_v30, 0.0 }
 0x1cc   : > { %680 = vadd.xlane.f32.xlu0 %v679_v31 }
 0x1e0   : > { %848 = vrot.lane.b32.xlu0 %v576_v15, %s1761_s24 }
 0x230   : > { %v751_v37 = vpop.xlane.xlu2 %750 }
 0x231   : > { %v752_v38 = vsub.f32 %v746_v25, %v751_v37 }
 0x233   : > { %v753_v39 = vmul.f32 1.442695, %v752_v38 }
 0x235   : > { %1467 = vpow2.f32 %v753_v39 }
 0x23b   : > { %v1468_v40 = vpop.eup %1467 }
 0x23c   : > { %v755_v41 = vsel %vm646_vm1, %v1468_v40, 0.0 }
 0x23d   : > { %756 = vadd.xlane.f32.xlu2 %v755_v41 }
 0x23f   : > { %v681_v42 = vpop.xlane.xlu0 %680 }
 0x240   : > { %1469 = vrcp.f32 %v681_v42  ;;  %v693_v46 = vand.u32 2147483648, %v681_v42  ;;  %v691_v48 = vand.u32 2147483647, %v681_v42  ;;  %vm687_vm3 = vweird.f32 %v681_v42 }
 0x242   : > { %v694_v50 = vor.u32 1.1754944e-38, %v693_v46  ;;  %vm692_vm5 = vcmp.eq.f32.partialorder %v691_v48, 8.507059e+37 }
 0x246   : > { %v1470_v43 = vpop.eup %1469 }
 0x247   : > { %v683_v44 = vmul.f32 %v1470_v43, %v681_v42  ;;  %vm688_vm2 = vweird.f32 %v1470_v43 }
 0x248   : > { %vm689_vm4 = vmor %vm687_vm3, %vm688_vm2 }
 0x249   : > { %v684_v45 = vsub.f32 1.0, %v683_v44 }
 0x24b   : > { %v685_v47 = vmul.f32 %v1470_v43, %v684_v45 }
 0x24d   : > { %v686_v49 = vadd.f32 %v1470_v43, %v685_v47 }
 0x24f   : > { %v690_v51 = vsel %vm689_vm4, %v1470_v43, %v686_v49  ;;  %v636_v49 = vld [vmem:[#allocation10 + $0x18] sm:$0xff] }
 0x250   : > { %v695_v52 = vsel %vm692_vm5, %v694_v50, %v690_v51  ;;  %v635_v50 = vld [vmem:[#allocation10 + $0x10] sm:$0xff] }
 0x251   : > { %v696_v53 = vmul.f32 %v1466_v30, %v695_v52  ;;  %946 = vmatpush.msra.mxu2 %v635_v50 }
 0x252   : > { %v849_v54 = vpop.permute.xlu0 %848 }
 0x253   : > { %697 = vst.msk [vmem:[%s1982_s21] sm:$0xff] %vm646_vm1, %v696_v53  ;;  %1321 = vmatmul.msk.f32.vlgmr.msrb.gmra.mxu3 %vm646_vm1, %v696_v53  ;;  %1329 = vmatmul.msk.f32.vlgmr.msra.gmra.mxu0 %vm646_vm1, %v849_v54 }
 0x254   : > { %1333 = vmatpush.xpose.msk.msrb.mxu3 %vm646_vm1, %v955_v32 }
 0x2b0   : > { %v757_v55 = vpop.xlane.xlu2 %756 }
 0x2b1   : > { %1471 = vrcp.f32 %v757_v55  ;;  %v769_v59 = vand.u32 2147483648, %v757_v55  ;;  %v767_v61 = vand.u32 2147483647, %v757_v55  ;;  %vm763_vm7 = vweird.f32 %v757_v55 }
 0x2b3   : > { %v770_v63 = vor.u32 1.1754944e-38, %v769_v59  ;;  %vm768_vm9 = vcmp.eq.f32.partialorder %v767_v61, 8.507059e+37 }
 0x2b7   : > { %v1472_v56 = vpop.eup %1471 }
 0x2b8   : > { %v759_v57 = vmul.f32 %v1472_v56, %v757_v55  ;;  %vm764_vm6 = vweird.f32 %v1472_v56 }
 0x2b9   : > { %vm765_vm8 = vmor %vm763_vm7, %vm764_vm6 }
 0x2ba   : > { %v760_v58 = vsub.f32 1.0, %v759_v57 }
 0x2bc   : > { %v761_v60 = vmul.f32 %v1472_v56, %v760_v58 }
 0x2be   : > { %v762_v62 = vadd.f32 %v1472_v56, %v761_v60 }
 0x2c0   : > { %v766_v0 = vsel %vm765_vm8, %v1472_v56, %v762_v62 }
 0x2c1   : > { %v771_v1 = vsel %vm768_vm9, %v770_v63, %v766_v0 }
 0x2c2   : > { %v772_v2 = vmul.f32 %v1468_v40, %v771_v1 }
 0x2c4   : > { %1324 = vst.msk [vmem:[%s1982_s21 + $0x8] sm:$0xff] %vm646_vm1, %v772_v2 }
 0x2d0   : > { %v873_v3 = vpop.f32.mrf.mxu0 }
 0x2d1   : > { %v876_v4 = vsel %vm646_vm1, %v873_v3, -inf }
 0x2d2   : > { %877 = vmax.xlane.f32.xlu1 %v876_v4 }
 0x2d6   : > { %v718_v5 = vpop.f32.mrf.mxu3 }
 0x2d7   : > { %1327 = vmatmul.msk.f32.vlgmr.msra.gmra.mxu3 %vm646_vm1, %v718_v5 }
 0x2df   : > { %1334 = vmatmul.msk.f32.vlgmr.msrb.gmra.mxu3 %vm646_vm1, %v953_v6 }
 0x345   : > { %v878_v7 = vpop.xlane.xlu1 %877 }
 0x346   : > { %v879_v8 = vsub.f32 %v873_v3, %v878_v7 }
 0x348   : > { %v880_v9 = vmul.f32 1.442695, %v879_v8 }
 0x34a   : > { %1473 = vpow2.f32 %v880_v9 }
 0x350   : > { %v1474_v10 = vpop.eup %1473 }
 0x351   : > { %v882_v11 = vsel %vm646_vm1, %v1474_v10, 0.0 }
 0x352   : > { %883 = vadd.xlane.f32.xlu2 %v882_v11 }
 0x35a   : > { %v1995_v12 = vpop.f32.mrf.mxu3 }
 0x362   : > { %v977_v13 = vpop.f32.mrf.mxu3 }
 0x363   : > { %v980_v14 = vsel %vm646_vm1, %v977_v13, -inf }
 0x364   : > { %981 = vmax.xlane.f32.xlu0 %v980_v14 }
 0x36a   : > { %776 = vrot.lane.b32.xlu2 %v1977_v35, %s1762_s27  ;;  %s1065_s27 = scalar_lea.sflag [#allocation13], %s1933_s28 }
 0x378   : > { %1006 = vrot.lane.b32.xlu0 %v1977_v35, %s1763_s26 }
 0x3c5   : > { %v884_v15 = vpop.xlane.xlu2 %883 }
 0x3c6   : > { %1475 = vrcp.f32 %v884_v15  ;;  %v896_v20 = vand.u32 2147483648, %v884_v15  ;;  %v894_v22 = vand.u32 2147483647, %v884_v15  ;;  %vm890_vm11 = vweird.f32 %v884_v15 }
 0x3c8   : > { %v897_v24 = vor.u32 1.1754944e-38, %v896_v20  ;;  %vm895_vm13 = vcmp.eq.f32.partialorder %v894_v22, 8.507059e+37 }
 0x3cc   : > { %v1476_v16 = vpop.eup %1475 }
 0x3cd   : > { %v886_v17 = vmul.f32 %v1476_v16, %v884_v15  ;;  %v777_v18 = vpop.permute.xlu2 %776  ;;  %vm891_vm10 = vweird.f32 %v1476_v16 }
 0x3ce   : > { %797 = vmatpush.msrb.mxu1 %v777_v18  ;;  %vm892_vm12 = vmor %vm890_vm11, %vm891_vm10 }
 0x3cf   : > { %v887_v19 = vsub.f32 1.0, %v886_v17  ;;  %1325 = vmatmul.msk.f32.vlgmr.msrb.gmra.mxu1 %vm646_vm1, %v772_v2 }
 0x3d1   : > { %v888_v21 = vmul.f32 %v1476_v16, %v887_v19 }
 0x3d3   : > { %v889_v23 = vadd.f32 %v1476_v16, %v888_v21 }
 0x3d5   : > { %v893_v25 = vsel %vm892_vm12, %v1476_v16, %v889_v23 }
 0x3d6   : > { %v898_v26 = vsel %vm895_vm13, %v897_v24, %v893_v25 }
 0x3d7   : > { %v982_v27 = vpop.xlane.xlu0 %981  ;;  %v899_v28 = vmul.f32 %v1474_v10, %v898_v26 }
 0x3d8   : > { %v983_v29 = vsub.f32 %v977_v13, %v982_v27 }
 0x3d9   : > { %1330 = vst.msk [vmem:[%s1982_s21 + $0x10] sm:$0xff] %vm646_vm1, %v899_v28 }
 0x3da   : > { %v984_v30 = vmul.f32 1.442695, %v983_v29 }
 0x3dc   : > { %1477 = vpow2.f32 %v984_v30 }
 0x3e2   : > { %v1478_v31 = vpop.eup %1477 }
 0x3e3   : > { %v986_v32 = vsel %vm646_vm1, %v1478_v31, 0.0 }
 0x3e4   : > { %987 = vadd.xlane.f32.xlu1 %v986_v32 }
 0x3ea   : > { %v1007_v33 = vpop.permute.xlu0 %1006 }
 0x3eb   : > { %1027 = vmatpush.msrb.mxu0 %v1007_v33 }
 0x3fd   : > { %902 = vrot.lane.b32.xlu1 %v1977_v35, %s1761_s24  ;;  %s1095_s24 = sshll.u32 %s1092_s7, 4  ;;  %s1096_s24 = int_to_ptr.hbm [resolvable:$true] %s1095_s24 }
 0x3fe   : > { %s1645_s26 = sshra.s32 %s1096_s24, 4  ;;  %s1646_s26 = int_to_ptr.hbm [resolvable:$true] %s1645_s26 }
 0x3ff   : > { %s1647_s1 = scalar_lea.hbm %s1646_s26, 32  ;;  %p1652_p9 = scmp.lt.s32.totalorder %s1646_s26, %s2087_s10 }
 0x400   : > { %p1648_p1 = scmp.ne.s32.totalorder %s1646_s26, %s1647_s1  ;;  %p1653_p10 = scmp.lt.s32.totalorder %s1651_s25, %s1647_s1 }
 0x402   : > { %p1649_p3 = pnand %p1648_p1, %p1913_p0  ;;  %p1654_p12 = por %p1653_p10, %p1652_p9 }
 0x404   : > { %p1650_p8 = pneg %p1649_p3 }
 0x406   : > { %p1655_p13 = pnand %p1654_p12, %p1650_p8 }
 0x44c   : > { %v799_v36 = vpop.f32.mrf.mxu1 }
 0x44d   : > { %1326 = vmatmul.msk.f32.vlgmr.msrb.gmra.mxu2 %vm646_vm1, %v799_v36 }
 0x457   : > { %v988_v37 = vpop.xlane.xlu1 %987 }
 0x458   : > { %1479 = vrcp.f32 %v988_v37  ;;  %v1000_v41 = vand.u32 2147483648, %v988_v37  ;;  %v998_v43 = vand.u32 2147483647, %v988_v37  ;;  %vm994_vm15 = vweird.f32 %v988_v37 }
 0x45a   : > { %v1001_v45 = vor.u32 1.1754944e-38, %v1000_v41  ;;  %vm999_vm3 = vcmp.eq.f32.partialorder %v998_v43, 8.507059e+37 }
 0x45e   : > { %v1480_v38 = vpop.eup %1479 }
 0x45f   : > { %v990_v39 = vmul.f32 %v1480_v38, %v988_v37  ;;  %vm995_vm14 = vweird.f32 %v1480_v38 }
 0x460   : > { %vm996_vm2 = vmor %vm994_vm15, %vm995_vm14 }
 0x461   : > { %v991_v40 = vsub.f32 1.0, %v990_v39 }
 0x463   : > { %v992_v42 = vmul.f32 %v1480_v38, %v991_v40 }
 0x465   : > { %v993_v44 = vadd.f32 %v1480_v38, %v992_v42 }
 0x467   : > { %v997_v35 = vsel %vm996_vm2, %v1480_v38, %v993_v44 }
 0x468   : > { %v1002_v46 = vsel %vm999_vm3, %v1001_v45, %v997_v35 }
 0x469   : > { %v1003_v47 = vmul.f32 %v1478_v31, %v1002_v46 }
 0x46b   : > { %1335 = vst.msk [vmem:[%s1982_s21 + $0x18] sm:$0xff] %vm646_vm1, %v1003_v47  ;;  %1336 = vmatmul.msk.f32.vlgmr.msrb.gmra.mxu0 %vm646_vm1, %v1003_v47 }
 0x46f   : > { %v903_v48 = vpop.permute.xlu1 %902 }
 0x470   : > { %923 = vmatpush.msra.mxu1 %v903_v48 }
 0x471   : > { %1331 = vmatmul.msk.f32.vlgmr.msra.gmra.mxu1 %vm646_vm1, %v899_v28 }
 0x472   : > { %1050 = vmatpush.msrb.mxu1 %v636_v49 }
 0x4e8   : > { %v1029_v51 = vpop.f32.mrf.mxu0 }
 0x4e9   : > { %1337 = vmatmul.msk.f32.vlgmr.msrb.gmra.mxu1 %vm646_vm1, %v1029_v51 }
 0x4ee   : > { %v925_v52 = vpop.f32.mrf.mxu1 }
 0x4ef   : > { %1332 = vmatmul.msk.f32.vlgmr.msra.gmra.mxu2 %vm646_vm1, %v925_v52 }
 0x4f0   : > { %1658 = shalt.err (!%p1655_p13)
}
 0x4f1   : > { %s1764_s21 = smov 128   ;;  %s1765_s19 = smov 8   ;;  %v1464_v53 = vld [vmem:[%s2085_s8] ss:$0 sm:$0xff]  ;;  %v822_v54 = vpop.f32.mrf.mxu2 }
 0x4f2   : > { %1365 = dma.vmem_to_hbm [thread:$0]  (%p1913_p0), %s1094_s20, 512, %s1096_s24, %s1065_s27, %s1764_s21, %s1764_s21, %s1765_s19   ;;  %v846_v55 = vadd.f32 %v1995_v12, %v822_v54 }
 0x4f3   : > { %s2109_s7 = sshll.u32 %s1933_s28, 3  ;;  %s1340_s0 = sshll.u32 %s1745_s16, 3 }
 0x4f4   : > { %s525_s29 = scalar_lea.vmem [#allocation11], %s2109_s7  ;;  %s1075_s26 = scalar_lea.hbm %s2086_s9, %s1340_s0 }
 0x4f5   : > { %645 = vst.msk [vmem:[%s525_s29] sm:$0xff] %vm552_vm0, %v1464_v53  ;;  %s1077_s20 = sshll.u32 %s525_s29, 4  ;;  %s1079_s24 = sshll.u32 %s1075_s26, 4  ;;  %s1078_s20 = int_to_ptr.vmem [resolvable:$true] %s1077_s20  ;;  %s1080_s24 = int_to_ptr.hbm [resolvable:$true] %s1079_s24 }
 0x4f6   : > { %s1060_s16 = scalar_lea.sflag [#allocation4], %s1933_s28  ;;  %s1673_s27 = sshra.s32 %s1080_s24, 4  ;;  %s1674_s27 = int_to_ptr.hbm [resolvable:$true] %s1673_s27 }
 0x4f7   : > { %s1675_s1 = scalar_lea.hbm %s1674_s27, 8  ;;  %s1679_s19 = scalar_lea.hbm %s2086_s9, 16 }
 0x4f8   : > { %p1676_p2 = scmp.ne.s32.totalorder %s1674_s27, %s1675_s1  ;;  %p1680_p11 = scmp.lt.s32.totalorder %s1674_s27, %s2086_s9 }
 0x4f9   : > { %p1681_p1 = scmp.lt.s32.totalorder %s1679_s19, %s1675_s1 }
 0x4fa   : > { %p1677_p4 = pnand %p1676_p2, %p1913_p0 }
 0x4fb   : > { %p1682_p3 = por %p1681_p1, %p1680_p11 }
 0x4fc   : > { %v1056_v59 = vld [vmem:[%s525_s29] sm:$0xff]  ;;  %p1678_p7 = pneg %p1677_p4 }
 0x4fe   : > { %p1683_p8 = pnand %p1682_p3, %p1678_p7 }
 0x566   : > { %v1052_v58 = vpop.f32.mrf.mxu1 }
 0x572   : > { %v948_v56 = vpop.f32.mrf.mxu2 }
 0x573   : > { %v951_v57 = vadd.f32 %v948_v56, %v846_v55 }
 0x575   : > { %v1055_v60 = vadd.f32 %v1052_v58, %v951_v57 }
 0x577   : > { %v1057_v61 = vadd.f32 %v1056_v59, %v1055_v60 }
 0x579   : > { %1058 = vst.msk [vmem:[%s525_s29] sm:$0xff] %vm552_vm0, %v1057_v61 }
 0x57a   : > { %1686 = shalt.err (!%p1683_p8)
}
 0x57b   : > { %1364 = dma.vmem_to_hbm [thread:$0]  (%p1913_p0), %s1078_s20, 128, %s1080_s24, %s1060_s16  }
 0x57c PF: > { %s1110_s28 = sand.u32 1, %s1733_s13   ;;  %p1386_p9 = pnand %p1305_p6, %p1920_p5 }
 0x57d   : > { %s1111_s7 = scalar_lea.sflag [#allocation4], %s1110_s28 }
 0x57e   : > { %p1387_p10 = pneg %p1386_p9 }
 0x580   : > { %1724 = dma.done.wait (%p1387_p10), %s1111_s7, 128  }
 0x581   : > { %1726 = vsyncadd (%p1387_p10), %s1111_s7, 4294967168  ;;  %s1121_s29 = scalar_lea.sflag [#allocation13], %s1110_s28 }
 0x582   : > { %1728 = dma.done.wait (%p1387_p10), %s1121_s29, 512  }
 0x583   : > { %1730 = vsyncadd (%p1387_p10), %s1121_s29, 4294966784  ;;  %s32_s18 = sadd.s32 1, %s1753_s18   ;;  %s2110_s13 = smov %s1737_s14 }
 0x584   : > { %p29_p12 = scmp.ge.s32.totalorder %s32_s18, 4   ;;  %s2111_s14 = smov %s1741_s15 }
 0x585   : > { %s2112_s15 = smov %s1918_s12  ;;  %s2113_s16 = smov %s1749_s17 }
 0x586   : > { %s2114_s17 = smov %s2116_s30  ;;  %31 = sbr.rel (!%p29_p12) target bundleno = 17 (0x11), region = 154 }
 0x58b   :  { %1127 = vsyncpa [#allocation3], 1 }
 0x58c   :  { %1129 = vsyncpa [#allocation3 + $0x1], 1 }
 0x58d   :  { %1130 = vsyncpa [#allocation6], 1 }
 0x58e   :  { %1131 = vsyncpa [#allocation9], 1 }
 0x58f   :  { %1132 = vsyncpa [#allocation4], 1 }
 0x590   :  { %1134 = vsyncpa [#allocation4 + $0x1], 1 }
 0x591   :  { %1135 = vsyncpa [#allocation13], 1 }
 0x592   :  { %1137 = vsyncpa [#allocation13 + $0x1], 1 }

</bundles_post_ra>
